<compile_context>
chip_gen: v7x
topology: tpu7x:2x2x1
jax: 0.10.0
libtpu: 0.0.40
codegen_flags: <defaults>
</compile_context>

<pallas_src>
import math
from functools import partial

import jax
import jax.numpy as jnp
import numpy as np
from jax.experimental import pallas as pl
from jax.experimental.pallas import tpu as pltpu

# CIPNN hyper-parameters (defaults of the PyTorch module)
STABLE_NUM = 1e-20
SCALER_FACTOR = 4.13273
MONTE_CARLO_NUM = 2
GAMMA = 0.9
BETA = 1.0
NUM_PARAMS = 2

_LOG_2PI = math.log(2.0 * math.pi)
_LOG_SCALER = math.log(SCALER_FACTOR)
_LOG_MIN_VAR = math.log(1e-20)     # reference clamps var at 1e-20
_LOG_CLAMP = math.log(1e20)        # reference clamps the joint at 1e20

_VMEM_BUDGET_BYTES = 40 * 1024 * 1024   # resident-tile budget, safe on v7x (64 MiB / TC)
_VMEM_LIMIT_BYTES = 48 * 1024 * 1024    # explicit scoped-VMEM limit (v5e default is 16 MiB)


def _round_up(a, b):
    return ((a + b - 1) // b) * b


def _cipnn_prob_kernel(x_ref, w_ref, yext_ref, prob_ref, numy_acc, prob_acc,
                       *, inv_m, den_col):
    """Grid = (row-tile i [parallel], monte-carlo m [arbitrary], T-tile k [arbitrary]).

    x_ref    [R, K_pad]    per-sample features [z, z^2, 1, 0...] for (row tile i, sample m)
    w_ref    [K_pad, TT]   precomputed Gaussian coefficients, T tile k
    yext_ref [TT, Y_pad]   bf16 one-hot labels; column `den_col` is all-ones for real T rows
                           -> the numerator matmul also produces sum_t joint (denominator).
    prob_ref [R, Y_pad]    output posterior tile (written once, at the last (m, k))
    numy_acc [R, Y_pad]    f32 scratch: accumulates joint @ y_ext over T tiles (per m)
    prob_acc [R, Y_pad]    f32 scratch: accumulates probs / M over m
    """
    m = pl.program_id(1)
    k = pl.program_id(2)
    last_m = pl.num_programs(1) - 1
    last_k = pl.num_programs(2) - 1

    @pl.when(jnp.logical_and(m == 0, k == 0))
    def _init_prob_acc():
        prob_acc[...] = jnp.zeros_like(prob_acc)

    @pl.when(k == 0)
    def _init_numy_acc():
        numy_acc[...] = jnp.zeros_like(numy_acc)

    # log joint probability of all latent dims as ONE small-K MXU matmul
    # (coefficients precomputed once in the wrapper; padded rows/cols are zero).
    logj = jnp.dot(x_ref[...], w_ref[...],
                   preferred_element_type=jnp.float32)                  # [R, TT]
    joint = jnp.exp(jnp.minimum(logj, _LOG_CLAMP))                      # [R, TT], <= 1e20
    # TODO(synk): on v6e/v7x a bf16 exp would double EUP throughput if exp ever binds.

    # One MXU matmul gives both per-class numerators and the denominator (ones column);
    # padded T rows of y_ext are all-zero so they contribute nothing. y_ext is exact bf16
    # (0/1 values) -> cast up so the matmul itself stays exact f32.
    numy_acc[...] += jnp.dot(joint, yext_ref[...].astype(jnp.float32),
                             preferred_element_type=jnp.float32)        # [R, Y_pad]

    @pl.when(k == last_k)
    def _finish_sample():
        acc = numy_acc[...]                                             # [R, Y_pad]
        denom = acc[:, den_col:den_col + 1]                             # [R, 1] == sum_t joint
        inv = pl.reciprocal(jnp.maximum(denom, STABLE_NUM), approx=True)
        probs = jnp.maximum(acc, STABLE_NUM) * inv                      # clamp_min / clamp_min
        prob_acc[...] += probs * inv_m                                  # Monte-Carlo average

    @pl.when(jnp.logical_and(m == last_m, k == last_k))
    def _write_output():
        prob_ref[...] = jnp.clip(prob_acc[...], 0.0, 1.0)


def _vmem_bytes(r, k_pad, tt, y_pad):
    """Estimated VMEM footprint for a given T tile (double-buffered inputs + scratch)."""
    return (2 * r * k_pad * 4        # x tile
            + 2 * k_pad * tt * 4     # w tile
            + 2 * tt * y_pad * 2     # y_ext tile (bf16)
            + 2 * r * y_pad * 4      # output tile
            + 2 * r * y_pad * 4      # scratch accumulators
            + 2 * r * tt * 4)        # logj / joint intermediates


def cipnn_probability(z_mbn, mean_T, log_var_T, y_true_T):
    """Posterior P^Z(Y|X).

    z_mbn     [M, B, N]  reparameterized samples (m outer)
    mean_T    [T, N]     recorded gaussian means
    log_var_T [T, N]     recorded log-variances
    y_true_T  [T, Y]     recorded one-hot labels
    returns   [B, Y]
    """
    M, B, N = z_mbn.shape
    T, Y = y_true_T.shape
    K = 2 * N + 1

    # ---------------- tile sizes ----------------
    K_pad = _round_up(K, 128)                # lane-dense MXU contracting dim
    Y_pad = _round_up(Y + 1, 128)            # lane-dense output; +1 for the "ones" column

    B8 = _round_up(B, 8)
    if B8 <= 8:
        R = B8                               # too small to split
    elif B8 <= 1024:
        R = _round_up((B8 + 1) // 2, 8)      # >= 2 row tiles -> both v7x TensorCores busy
    else:
        R = 512                              # large tiles for big batches
    B_pad = _round_up(B8, R)

    # Keep the whole recorder resident (grid-invariant W / y_ext blocks => DMA'd once) when
    # it fits the budget; otherwise fall back to a 128-aligned T-tile ladder.
    T_128 = _round_up(T, 128)
    TT = 128
    for cand in (T_128, 8192, 4096, 2048, 1024, 512, 256, 128):
        if cand <= T_128 and _vmem_bytes(R, K_pad, cand, Y_pad) <= _VMEM_BUDGET_BYTES:
            TT = cand
            break
    T_pad = _round_up(T, TT)

    # ---------------- wrapper-precomputed inputs (concat/pad, no .at[].set copies) --------
    # logj[r,t] = sum_n [log_coef - (z-mean)^2 * inv_2var]
    #           = z @ (2*mean*inv_2var) + z^2 @ (-inv_2var) + bias[t]
    z32 = z_mbn.astype(jnp.float32)
    x = jnp.concatenate([z32, z32 * z32, jnp.ones((M, B, 1), jnp.float32)],
                        axis=-1)                                            # [M, B, K]
    x_p = jnp.pad(x, ((0, 0), (0, B_pad - B), (0, K_pad - K)))

    mean = mean_T.astype(jnp.float32)                                       # [T, N]
    log_var = jnp.maximum(log_var_T.astype(jnp.float32), _LOG_MIN_VAR)      # var clamp @1e-20
    inv_2var = 0.5 * jnp.exp(-log_var)                                      # 1 / (2 var)
    log_coef = (_LOG_SCALER - 0.5 * _LOG_2PI) - 0.5 * log_var
    bias = jnp.sum(log_coef - mean * mean * inv_2var, axis=1, keepdims=True)  # [T, 1]
    w = jnp.concatenate([2.0 * mean * inv_2var, -inv_2var, bias], axis=1)   # [T, K]
    w_p = jnp.pad(jnp.transpose(w), ((0, K_pad - K), (0, T_pad - T)))       # [K_pad, T_pad]

    y_ext = jnp.concatenate([y_true_T.astype(jnp.float32),
                             jnp.ones((T, 1), jnp.float32)], axis=1)        # [T, Y+1]
    y_ext = jnp.pad(y_ext, ((0, T_pad - T), (0, Y_pad - (Y + 1))))
    y_ext = y_ext.astype(jnp.bfloat16)      # 0/1 one-hot + ones column: exact in bf16

    # ---------------- pallas_call ----------------
    grid = (B_pad // R, M, T_pad // TT)
    grid_steps = grid[0] * grid[1] * grid[2]
    cost = pl.CostEstimate(
        flops=2 * grid_steps * (R * K_pad * TT + R * TT * Y_pad),
        transcendentals=grid_steps * R * TT + grid[0] * M * R * Y_pad,
        bytes_accessed=(x_p.size * 4 + w_p.size * 4 + y_ext.size * 2 + B_pad * Y_pad * 4),
    )

    kernel = partial(_cipnn_prob_kernel, inv_m=1.0 / M, den_col=Y)

    prob_pad = pl.pallas_call(
        kernel,
        out_shape=jax.ShapeDtypeStruct((B_pad, Y_pad), jnp.float32),
        grid_spec=pltpu.PrefetchScalarGridSpec(
            num_scalar_prefetch=0,
            grid=grid,
            in_specs=[
                # x: leading M axis squeezed; block varies with (m, i)
                pl.BlockSpec((None, R, K_pad), lambda i, m, k: (m, i, 0)),
                # w / y_ext: grid-invariant when T_pad == TT (DMA'd once)
                pl.BlockSpec((K_pad, TT), lambda i, m, k: (0, k)),
                pl.BlockSpec((TT, Y_pad), lambda i, m, k: (k, 0)),
            ],
            out_specs=pl.BlockSpec((R, Y_pad), lambda i, m, k: (i, 0)),
            scratch_shapes=[
                pltpu.VMEM((R, Y_pad), jnp.float32),   # num_y (+denominator) accumulator
                pltpu.VMEM((R, Y_pad), jnp.float32),   # Monte-Carlo prob accumulator
            ],
        ),
        compiler_params=pltpu.CompilerParams(
            dimension_semantics=("parallel", "arbitrary", "arbitrary"),
            vmem_limit_bytes=_VMEM_LIMIT_BYTES),
        cost_estimate=cost,
    )(x_p, w_p, y_ext)

    return prob_pad[:B, :Y]


def cipnn_forward(logits, y_true, key):
    """Functional equivalent of CIPNN.forward(logits, y_trues=[y_true]) on the *first* call
    (recorder empty -> params_T = params, y_true_T = y_true), model_type='cipnn',
    select_variables=None (all latent variables)."""
    B = logits.shape[0]
    params = logits.reshape(B, -1, NUM_PARAMS)                   # [B, N, 2]
    mean, log_var = params[:, :, 0], params[:, :, 1]             # [B, N]

    # parameter_recorder (first observation)
    # TODO(synk): the stateful vstack/forget_num recorder bookkeeping lives outside the kernel.
    params_T = params                                            # [T=B, N, 2]
    y_true_T = y_true.astype(jnp.float32)                        # [T, Y]

    # gaussian_sample_and_reparameterize (glue; torch.distributions.Normal -> jax.random)
    eps = jax.random.normal(key, (MONTE_CARLO_NUM, B, mean.shape[1]), dtype=jnp.float32)
    std = jnp.exp(log_var / 2.0)
    z_mbn = mean[None, :, :] + eps * std[None, :, :]             # [M, B, N]
    z = jnp.transpose(z_mbn, (1, 0, 2))                          # [B, M, N] (returned latents)

    # Pallas kernel: observation + inference posterior P^Z(Y|X)
    probability = cipnn_probability(z_mbn, params_T[:, :, 0], params_T[:, :, 1], y_true_T)

    # main loss (cipnn branch) + KL loss (tiny reductions -> plain JAX glue)
    probs_sum = jnp.sum(probability * y_true, axis=1)            # [B]
    main_loss = jnp.sum(-jnp.log(probs_sum)) / B
    latent_kl = 0.5 * (-1.0 - log_var + (1.0 - GAMMA) ** 2 * mean ** 2
                       + jnp.exp(log_var)).mean(axis=0)
    kl_loss = latent_kl.sum() * BETA

    return dict(params=params,
                losses=[main_loss, kl_loss],
                probability={0: probability},
                latent_vars=[z])


def _reference_probability(z, params_T, y_true_T):
    """Pure-JAX reference of observation_and_inference (mirrors the PyTorch code)."""
    mean_T, log_var_T = params_T[:, :, 0], params_T[:, :, 1]     # [T, N]
    var = jnp.maximum(jnp.exp(log_var_T), 1e-20)
    z_ = z[:, :, None, :]                                        # [B, M, 1, N]
    p = 1.0 / jnp.sqrt(2.0 * jnp.pi * var) * jnp.exp(-jnp.square(z_ - mean_T) / (2.0 * var))
    p = p * SCALER_FACTOR
    joint = jnp.minimum(jnp.prod(p, axis=-1), 1e20)              # [B, M, T]
    num_y = jnp.einsum('bmt,ty->bmy', joint, y_true_T)
    num_j = jnp.sum(joint, axis=-1, keepdims=True)
    probs = jnp.maximum(num_y, STABLE_NUM) / jnp.maximum(num_j, STABLE_NUM)
    prob = jnp.sum(probs, axis=1) / joint.shape[1]
    return jnp.clip(prob, 0.0, 1.0)


if __name__ == "__main__":
    # small shapes: batch=2, latent dim n=8 (logits has 2*n=16 columns), 4 classes
    B, N, Y = 2, 8, 4
    key = jax.random.PRNGKey(0)
    k_logits, k_labels, k_eps = jax.random.split(key, 3)

    logits = jax.random.normal(k_logits, (B, N * NUM_PARAMS), dtype=jnp.float32)
    labels = jax.random.randint(k_labels, (B,), 0, Y)
    y_true = jax.nn.one_hot(labels, Y, dtype=jnp.float32)        # [B, Y]

    out = cipnn_forward(logits, y_true, k_eps)
    prob = jax.block_until_ready(out["probability"][0])
    losses = [jax.block_until_ready(l) for l in out["losses"]]

    # verify kernel against the pure-JAX reference
    params = logits.reshape(B, -1, NUM_PARAMS)
    ref_prob = _reference_probability(out["latent_vars"][0], params, y_true)
    np.testing.assert_allclose(np.asarray(prob), np.asarray(ref_prob), rtol=1e-2, atol=1e-5)
    assert all(np.isfinite(np.asarray(l)) for l in losses)

    print("KERNEL_OK")
</pallas_src>

<mosaic_0001>
module attributes {stable_mosaic.version = 11 : i64} {
  func.func @_cipnn_prob_kernel(%arg0: i32, %arg1: i32, %arg2: i32, %arg3: memref<1x8x128xf32, #tpu.memory_space<vmem>>, %arg4: memref<128x128xf32, #tpu.memory_space<vmem>>, %arg5: memref<128x128xbf16, #tpu.memory_space<vmem>>, %arg6: memref<8x128xf32, #tpu.memory_space<vmem>>, %arg7: memref<8x128xf32, #tpu.memory_space<vmem>>, %arg8: memref<8x128xf32, #tpu.memory_space<vmem>>) attributes {dimension_semantics = [#tpu.dimension_semantics<parallel>, #tpu.dimension_semantics<arbitrary>, #tpu.dimension_semantics<arbitrary>], iteration_bounds = array<i64: 1, 2, 1>, scalar_prefetch = 0 : i64, scratch_operands = 2 : i64, tpu.core_type = #tpu.core_type<tc>, window_params = [{transform_indices = @transform_0, window_bounds = array<i64: 1, 8, 128>}, {transform_indices = @transform_1, window_bounds = array<i64: 128, 128>}, {transform_indices = @transform_2, window_bounds = array<i64: 128, 128>}, {transform_indices = @transform_3, window_bounds = array<i64: 8, 128>}]} {
    %c0_i32 = arith.constant 0 : i32
    %0 = arith.cmpi eq, %arg1, %c0_i32 : i32
    %c0_i32_0 = arith.constant 0 : i32
    %1 = arith.cmpi eq, %arg2, %c0_i32_0 : i32
    %2 = arith.andi %0, %1 : i1
    %3 = arith.extui %2 : i1 to i32
    %c0_i32_1 = arith.constant 0 : i32
    %4 = arith.cmpi ne, %3, %c0_i32_1 : i32
    scf.if %4 {
      %cst_20 = arith.constant 0.000000e+00 : f32
      %29 = vector.broadcast %cst_20 : f32 to vector<8x128xf32>
      %c0_21 = arith.constant 0 : index
      %c0_22 = arith.constant 0 : index
      %30 = vector.load %arg8[%c0_21, %c0_22] : memref<8x128xf32, #tpu.memory_space<vmem>>, vector<8x128xf32>
      tpu.vector_store %arg8[%c0_21, %c0_22], %29 {strides = array<i32>} : memref<8x128xf32, #tpu.memory_space<vmem>>, vector<8x128xf32>,
    } else {
    }
    %c0_i32_2 = arith.constant 0 : i32
    %5 = arith.cmpi eq, %arg2, %c0_i32_2 : i32
    %6 = arith.extui %5 : i1 to i32
    %c0_i32_3 = arith.constant 0 : i32
    %7 = arith.cmpi ne, %6, %c0_i32_3 : i32
    scf.if %7 {
      %cst_20 = arith.constant 0.000000e+00 : f32
      %29 = vector.broadcast %cst_20 : f32 to vector<8x128xf32>
      %c0_21 = arith.constant 0 : index
      %c0_22 = arith.constant 0 : index
      %30 = vector.load %arg7[%c0_21, %c0_22] : memref<8x128xf32, #tpu.memory_space<vmem>>, vector<8x128xf32>
      tpu.vector_store %arg7[%c0_21, %c0_22], %29 {strides = array<i32>} : memref<8x128xf32, #tpu.memory_space<vmem>>, vector<8x128xf32>,
    } else {
    }
    %c0 = arith.constant 0 : index
    %c0_4 = arith.constant 0 : index
    %c0_5 = arith.constant 0 : index
    %8 = vector.load %arg3[%c0, %c0_4, %c0_5] : memref<1x8x128xf32, #tpu.memory_space<vmem>>, vector<1x8x128xf32>
    %9 = vector.shape_cast %8 : vector<1x8x128xf32> to vector<8x128xf32>
    %c0_6 = arith.constant 0 : index
    %c0_7 = arith.constant 0 : index
    %10 = vector.load %arg4[%c0_6, %c0_7] : memref<128x128xf32, #tpu.memory_space<vmem>>, vector<128x128xf32>
    %cst = arith.constant dense<0.000000e+00> : vector<8x128xf32>
    %11 = tpu.matmul %9, %10, %cst {dimension_numbers = #tpu.dot_dimension_numbers<[1], [0], [0], [1], [0, 0, 1, 1], [], []>} : vector<8x128xf32>, vector<128x128xf32>, vector<8x128xf32> -> vector<8x128xf32>
    %cst_8 = arith.constant 4.605170e+01 : f32
    %12 = vector.broadcast %cst_8 : f32 to vector<8x128xf32>
    %13 = arith.minimumf %11, %12 : vector<8x128xf32>
    %14 = math.exp %13 : vector<8x128xf32>
    %c0_9 = arith.constant 0 : index
    %c0_10 = arith.constant 0 : index
    %15 = vector.load %arg7[%c0_9, %c0_10] : memref<8x128xf32, #tpu.memory_space<vmem>>, vector<8x128xf32>
    %c0_11 = arith.constant 0 : index
    %c0_12 = arith.constant 0 : index
    %16 = vector.load %arg5[%c0_11, %c0_12] : memref<128x128xbf16, #tpu.memory_space<vmem>>, vector<128x128xbf16>
    %17 = arith.extf %16 : vector<128x128xbf16> to vector<128x128xf32>
    %cst_13 = arith.constant dense<0.000000e+00> : vector<8x128xf32>
    %18 = tpu.matmul %14, %17, %cst_13 {dimension_numbers = #tpu.dot_dimension_numbers<[1], [0], [0], [1], [0, 0, 1, 1], [], []>} : vector<8x128xf32>, vector<128x128xf32>, vector<8x128xf32> -> vector<8x128xf32>
    %19 = arith.addf %15, %18 : vector<8x128xf32>
    %c0_14 = arith.constant 0 : index
    %c0_15 = arith.constant 0 : index
    %20 = vector.load %arg7[%c0_14, %c0_15] : memref<8x128xf32, #tpu.memory_space<vmem>>, vector<8x128xf32>
    tpu.vector_store %arg7[%c0_14, %c0_15], %19 {strides = array<i32>} : memref<8x128xf32, #tpu.memory_space<vmem>>, vector<8x128xf32>,
    %c0_i32_16 = arith.constant 0 : i32
    %21 = arith.cmpi eq, %arg2, %c0_i32_16 : i32
    %22 = arith.extui %21 : i1 to i32
    %c0_i32_17 = arith.constant 0 : i32
    %23 = arith.cmpi ne, %22, %c0_i32_17 : i32
    scf.if %23 {
      %c0_20 = arith.constant 0 : index
      %c0_21 = arith.constant 0 : index
      %29 = vector.load %arg7[%c0_20, %c0_21] : memref<8x128xf32, #tpu.memory_space<vmem>>, vector<8x128xf32>
      %30 = vector.extract_strided_slice %29 {offsets = [0, 4], sizes = [8, 1], strides = [1, 1]} : vector<8x128xf32> to vector<8x1xf32>
      %cst_22 = arith.constant 9.99999968E-21 : f32
      %31 = vector.broadcast %cst_22 : f32 to vector<8x1xf32>
      %32 = arith.maximumf %30, %31 : vector<8x1xf32>
      %33 = tpu.reciprocal %32 {approx = true} : vector<8x1xf32> -> vector<8x1xf32>
      %cst_23 = arith.constant 9.99999968E-21 : f32
      %34 = vector.broadcast %cst_23 : f32 to vector<8x128xf32>
      %35 = arith.maximumf %29, %34 : vector<8x128xf32>
      %36 = vector.broadcast %33 : vector<8x1xf32> to vector<8x128xf32>
      %37 = arith.mulf %35, %36 : vector<8x128xf32>
      %c0_24 = arith.constant 0 : index
      %c0_25 = arith.constant 0 : index
      %38 = vector.load %arg8[%c0_24, %c0_25] : memref<8x128xf32, #tpu.memory_space<vmem>>, vector<8x128xf32>
      %cst_26 = arith.constant 5.000000e-01 : f32
      %39 = vector.broadcast %cst_26 : f32 to vector<8x128xf32>
      %40 = arith.mulf %37, %39 : vector<8x128xf32>
      %41 = arith.addf %38, %40 : vector<8x128xf32>
      %c0_27 = arith.constant 0 : index
      %c0_28 = arith.constant 0 : index
      %42 = vector.load %arg8[%c0_27, %c0_28] : memref<8x128xf32, #tpu.memory_space<vmem>>, vector<8x128xf32>
      tpu.vector_store %arg8[%c0_27, %c0_28], %41 {strides = array<i32>} : memref<8x128xf32, #tpu.memory_space<vmem>>, vector<8x128xf32>,
    } else {
    }
    %c1_i32 = arith.constant 1 : i32
    %24 = arith.cmpi eq, %arg1, %c1_i32 : i32
    %c0_i32_18 = arith.constant 0 : i32
    %25 = arith.cmpi eq, %arg2, %c0_i32_18 : i32
    %26 = arith.andi %24, %25 : i1
    %27 = arith.extui %26 : i1 to i32
    %c0_i32_19 = arith.constant 0 : i32
    %28 = arith.cmpi ne, %27, %c0_i32_19 : i32
    scf.if %28 {
      %c0_20 = arith.constant 0 : index
      %c0_21 = arith.constant 0 : index
      %29 = vector.load %arg8[%c0_20, %c0_21] : memref<8x128xf32, #tpu.memory_space<vmem>>, vector<8x128xf32>
      %cst_22 = arith.constant 0.000000e+00 : f32
      %cst_23 = arith.constant 1.000000e+00 : f32
      %30 = vector.broadcast %cst_22 : f32 to vector<8x128xf32>
      %31 = arith.maximumf %30, %29 : vector<8x128xf32>
      %32 = vector.broadcast %cst_23 : f32 to vector<8x128xf32>
      %33 = arith.minimumf %32, %31 : vector<8x128xf32>
      %c0_24 = arith.constant 0 : index
      %c0_25 = arith.constant 0 : index
      %34 = vector.load %arg6[%c0_24, %c0_25] : memref<8x128xf32, #tpu.memory_space<vmem>>, vector<8x128xf32>
      tpu.vector_store %arg6[%c0_24, %c0_25], %33 {strides = array<i32>} : memref<8x128xf32, #tpu.memory_space<vmem>>, vector<8x128xf32>,
    } else {
    }
    return
  }
  func.func @transform_0(%arg0: i32, %arg1: i32, %arg2: i32) -> (i32, i32, i32) {
    %c0_i32 = arith.constant 0 : i32
    %c0_i32_0 = arith.constant 0 : i32
    return %arg1, %arg0, %c0_i32 : i32, i32, i32
  }
  func.func @transform_1(%arg0: i32, %arg1: i32, %arg2: i32) -> (i32, i32) {
    %c0_i32 = arith.constant 0 : i32
    %c0_i32_0 = arith.constant 0 : i32
    return %c0_i32, %arg2 : i32, i32
  }
  func.func @transform_2(%arg0: i32, %arg1: i32, %arg2: i32) -> (i32, i32) {
    %c0_i32 = arith.constant 0 : i32
    %c0_i32_0 = arith.constant 0 : i32
    return %arg2, %c0_i32 : i32, i32
  }
  func.func @transform_3(%arg0: i32, %arg1: i32, %arg2: i32) -> (i32, i32) {
    %c0_i32 = arith.constant 0 : i32
    %c0_i32_0 = arith.constant 0 : i32
    return %arg0, %c0_i32 : i32, i32
  }
}

</mosaic_0001>

<bundles_post_ra>
// kernel: tpu_custom_call.1
= control target key start
LH: loop header
LB: loop body
LE: loop exit
PB: predicated region body
PF: predicated region fallthrough
CT: control target
= control target key end

     0   :  { %8 = vsyncpa [#allocation5], 0  ;;  %s1324_s0 = inlined_call_operand.hbm [shape: f32[2,8,128], index: 0, kind: input, shape index: {}]   ;;  %s1325_s1 = inlined_call_operand.hbm [shape: f32[128,128], index: 1, kind: input, shape index: {}]   ;;  %s1326_s2 = inlined_call_operand.hbm [shape: bf16[128,128], index: 2, kind: input, shape index: {}]   ;;  %s1327_s3 = inlined_call_operand.hbm [shape: f32[8,128], index: 3, kind: output, shape index: {}]  }
   0x1   :  { %10 = vsyncpa [#allocation5 + $0x1], 0 }
   0x2   :  { %11 = vsyncpa [#allocation8], 0 }
   0x3   :  { %12 = vsyncpa [#allocation6], 0  ;;  %s1086_s12 = smov 0   ;;  %s1088_s13 = smov 0  }
   0x4   :  { %s1090_s14 = smov 0   ;;  %s1092_s15 = smov 0  }
   0x5   :  { %s1094_s16 = smov 0   ;;  %s1096_s17 = smov 0  }
   0x6 LB: > { %s574_s18 = sadd.s32 4294967295, %s1051_s17   ;;  %p59_p0 = scmp.ne.s32.totalorder %s1035_s13, %s1031_s12  ;;  %s1051_s17 = sphi %s1096_s17, %s18_s17   ;;  %s1047_s16 = sphi %s1094_s16, %s1345_s16   ;;  %s1043_s15 = sphi %s1092_s15, %s1344_s15   ;;  %s1039_s14 = sphi %s1090_s14, %s1343_s14   ;;  %s1035_s13 = sphi %s1088_s13, %s1342_s13   ;;  %s1031_s12 = sphi %s1086_s12, %s1341_s12  }
   0x7   : > { %p1118_p1 = scmp.eq.s32.totalorder %s574_s18, 0  ;;  %p575_p2 = scmp.ge.s32.totalorder %s1051_s17, 1 }
   0x8   : > { %p148_p3 = scmp.lt.s32.totalorder %s1051_s17, 3  ;;  %s1053_s22 = smov [#allocation7]  }
   0x9   : > { %s1332_s19 = scalar_select %p1118_p1, 1, 0 }
   0xa   : > { %p1126_p4 = por %p1118_p1, %p59_p0  ;;  %p1130_p5 = pnand %p575_p2, %p148_p3 }
   0xb   : > { %s162_s23 = sshll.u32 %s1053_s22, 4  ;;  %s1054_s25 = smov [#allocation9]   ;;  %s163_s23 = int_to_ptr.vmem [resolvable:$true] %s162_s23 }
   0xc   : > { %s1333_s20 = scalar_select %p1126_p4, 1, 0 }
   0xd   : > { %s1334_s21 = scalar_select %p1130_p5, 1, 0 }
   0xe   : > { %p798_p6 = pneg %p1130_p5  ;;  %s178_s26 = sshll.u32 %s1054_s25, 4  ;;  %s1142_s26 = int_to_ptr.vmem [resolvable:$true] %s178_s26 }
   0xf   : > { %s881_s29 = scalar_lea.hbm %s1325_s1, 2048 }
  0x10   : > { %p1138_p7 = pnand %p798_p6, %p1118_p1  ;;  %p882_p8 = scmp.ne.s32.totalorder %s1325_s1, %s881_s29 }
  0x11   : > { %p888_p12 = scmp.lt.u32.totalorder %s881_s29, %s1325_s1 }
  0x12   : > { %p883_p9 = pneg %p1138_p7 }
  0x14   : > { %p884_p10 = pnand %p883_p9, %p882_p8 }
  0x16   : > { %p885_p11 = pneg %p884_p10 }
  0x18   : > { %p890_p13 = pnand %p888_p12, %p885_p11 }
  0x1a   : > { %893 = shalt.err (!%p890_p13)
}
  0x1b   : > { %s894_s7 = scalar_lea.vmem %s163_s23, 2048  ;;  %p902_p6 = scmp.lt.s32.totalorder %s163_s23, %s163_s23 }
  0x1c   : > { %p895_p0 = scmp.ne.s32.totalorder %s163_s23, %s894_s7  ;;  %p903_p1 = scmp.lt.s32.totalorder %s894_s7, %s894_s7 }
  0x1e   : > { %p897_p2 = pnand %p895_p0, %p883_p9  ;;  %p904_p4 = por %p903_p1, %p902_p6 }
  0x20   : > { %p898_p3 = pneg %p897_p2 }
  0x22   : > { %p905_p5 = pnand %p904_p4, %p898_p3 }
  0x24   : > { %908 = shalt.err (!%p905_p5)
}
  0x25   : > { %s1055_s8 = smov 128   ;;  %s1056_s9 = smov 8  }
  0x26   : > { %801 = dma.hbm_to_vmem [thread:$0]  (!%p1138_p7), %s1325_s1, 2048, %s163_s23, [#allocation8], %s1055_s8, %s1055_s8, %s1056_s9  }
  0x27   : > { %s909_s25 = scalar_lea.hbm %s1326_s2, 1024 }
  0x28   : > { %p910_p8 = scmp.ne.s32.totalorder %s1326_s2, %s909_s25  ;;  %p916_p5 = scmp.lt.u32.totalorder %s909_s25, %s1326_s2 }
  0x2a   : > { %p912_p1 = pnand %p910_p8, %p883_p9 }
  0x2c   : > { %p913_p4 = pneg %p912_p1 }
  0x2e   : > { %p918_p10 = pnand %p916_p5, %p913_p4 }
  0x30   : > { %921 = shalt.err (!%p918_p10)
}
  0x31   : > { %s922_s23 = scalar_lea.vmem %s1142_s26, 1024  ;;  %p930_p0 = scmp.lt.s32.totalorder %s1142_s26, %s1142_s26 }
  0x32   : > { %p923_p11 = scmp.ne.s32.totalorder %s1142_s26, %s922_s23  ;;  %p931_p2 = scmp.lt.s32.totalorder %s922_s23, %s922_s23 }
  0x34   : > { %p925_p12 = pnand %p923_p11, %p883_p9  ;;  %p932_p3 = por %p931_p2, %p930_p0 }
  0x36   : > { %p926_p13 = pneg %p925_p12 }
  0x38   : > { %p933_p6 = pnand %p932_p3, %p926_p13 }
  0x3a   : > { %936 = shalt.err (!%p933_p6)
}
  0x3b   : > { %s1057_s4 = smov 64   ;;  %s1058_s5 = smov 4  }
  0x3c   : > { %804 = dma.hbm_to_vmem [thread:$0]  (!%p1138_p7), %s1326_s2, 1024, %s1142_s26, [#allocation8], %s1057_s4, %s1057_s4, %s1058_s5  }
  0x3d   : > { %s33_s8 = sadd.s32 1, %s1047_s16  ;;  %s46_s9 = sadd.s32 1, %s1039_s14 }
  0x3e   : > { %p35_p9 = scmp.ge.s32.totalorder %s33_s8, 2  ;;  %p53_p8 = scmp.ne.s32.totalorder %s1039_s14, %s1035_s13 }
  0x3f   : > { %p54_p1 = scmp.eq.s32.totalorder %s1051_s17, 0  ;;  %p811_p4 = scmp.lt.s32.totalorder %s1051_s17, 2 }
  0x40   : > { %s1347_s8 = smov (%p35_p9, %s33_s8), 0  ;;  %s192_s10 = sand.u32 1, %s1039_s14  }
  0x41   : > { %p55_p5 = por %p54_p1, %p53_p8  ;;  %s41_s11 = ssub.s32 %s1047_s16, %s1347_s8 }
  0x42   : > { %p44_p10 = scmp.eq.s32.totalorder %s41_s11, 0  ;;  %s579_s12 = sshll.u32 %s192_s10, 3 }
  0x43   : > { %s580_s24 = sshll.u32 %s1047_s16, 7  ;;  %s196_s28 = scalar_lea.vmem [#allocation4], %s579_s12 }
  0x44   : > { %s1204_s22 = scalar_select %p44_p10, %s1039_s14, %s46_s9  }
  0x45   : > { %s1209_s27 = scalar_lea.hbm %s1324_s0, %s580_s24  ;;  %s204_s29 = sshll.u32 %s196_s28, 4  ;;  %s1211_s29 = int_to_ptr.vmem [resolvable:$true] %s204_s29 }
  0x46   : > { %p1215_p7 = pnand %p811_p4, %p55_p5  ;;  %s193_s23 = scalar_lea.sflag [#allocation5], %s192_s10 }
  0x47   : > { %s937_s4 = scalar_lea.hbm %s1209_s27, 128  ;;  %s942_s7 = scalar_lea.hbm %s1324_s0, 256 }
  0x48   : > { %p938_p11 = scmp.ne.s32.totalorder %s1209_s27, %s937_s4  ;;  %p939_p12 = pneg %p1215_p7 }
  0x49   : > { %p943_p2 = scmp.lt.u32.totalorder %s1209_s27, %s1324_s0  ;;  %p944_p3 = scmp.lt.u32.totalorder %s942_s7, %s937_s4 }
  0x4a   : > { %p940_p13 = pnand %p939_p12, %p938_p11  ;;  %p946_p9 = scmp.lt.u32.totalorder %s937_s4, %s1209_s27 }
  0x4b   : > { %p945_p6 = por %p944_p3, %p943_p2 }
  0x4c   : > { %p941_p0 = pneg %p940_p13 }
  0x4d   : > { %p947_p8 = por %p946_p9, %p945_p6 }
  0x4f   : > { %p948_p1 = pnand %p947_p8, %p941_p0 }
  0x51   : > { %951 = shalt.err (!%p948_p1)
}
  0x52   : > { %s952_s10 = scalar_lea.vmem %s1211_s29, 128  ;;  %s1059_s12 = smov [#allocation4]  }
  0x53   : > { %p953_p4 = scmp.ne.s32.totalorder %s1211_s29, %s952_s10  ;;  %s957_s24 = sshll.u32 %s1059_s12, 4  ;;  %s958_s24 = int_to_ptr.vmem [resolvable:$false] %s957_s24 }
  0x54   : > { %s959_s25 = scalar_lea.vmem %s958_s24, 256  ;;  %p960_p11 = scmp.lt.s32.totalorder %s1211_s29, %s958_s24 }
  0x55   : > { %p955_p5 = pnand %p953_p4, %p939_p12  ;;  %p961_p13 = scmp.lt.s32.totalorder %s959_s25, %s952_s10 }
  0x57   : > { %p956_p10 = pneg %p955_p5  ;;  %p962_p2 = por %p961_p13, %p960_p11 }
  0x59   : > { %p963_p3 = pnand %p962_p2, %p956_p10 }
  0x5b   : > { %966 = shalt.err (!%p963_p3)
}
  0x5c   : > { %808 = dma.hbm_to_vmem [thread:$0]  (!%p1215_p7), %s1209_s27, 128, %s1211_s29, %s193_s23  }
  0x5d   : > { %p1337_p0 = scmp.ne.s32.totalorder %s1334_s21, 0 }
  0x5e   : > { %s215_s26 = sand.u32 (!%p1337_p0), 1, %s1035_s13   ;;  %p1338_p12 = scmp.ne.s32.totalorder (!%p1337_p0), %s1333_s20, 0 }
  0x5f   : > { %213 = sbr.rel (%p1337_p0) target bundleno = 773 (0x305), region = 32  ;;  %s1247_s28 = sshll.u32 (!%p1337_p0), %s215_s26, 3 }
  0x60   : > { %s216_s4 = scalar_lea.sflag (!%p1337_p0), [#allocation5], %s215_s26  ;;  %s219_s5 = scalar_lea.vmem (!%p1337_p0), [#allocation4], %s1247_s28 }
  0x66   : > { %1018 = dma.done.wait (%p1338_p12), %s216_s4, 128  }
  0x67   : > { %1020 = vsyncadd (%p1338_p12), %s216_s4, 4294967168  ;;  %p1339_p6 = scmp.ne.s32.totalorder %s1332_s19, 0 }
  0x69   : > { %1022 = dma.done.wait (%p1339_p6), [#allocation8], 3072  }
  0x6a   : > { %1024 = vsyncadd (%p1339_p6), [#allocation8], 4294964224  ;;  %p246_p7 = scmp.eq.s32.totalorder %s1043_s15, 0 }
  0x6b   : > { %v1060_v0 = vmov (%p246_p7), 0.0  }
  0x6c   : > { %251 = sbr.rel (!%p246_p7) target bundleno = 115 (0x73), region = 48  ;;  %252 = vst [vmem:[#allocation3] sm:$0xff] (%p246_p7), %v1060_v0 }
  0x73 PF: > { %v258_v1 = vld [vmem:[#allocation7] sm:$0xff]  ;;  %v259_v2 = vld [vmem:[#allocation7 + $0x8] sm:$0xff]  ;;  %v260_v3 = vld [vmem:[#allocation7 + $0x10] sm:$0xff]  ;;  %v1061_v4 = vmov 0.0|0.0   ;;  %vm1062_vm0 = vmmov 0   ;;  %v1063_v7 = vmov 0.0  }
  0x74   : > { %736 = vmatprep.subr.bf16.mxu0 %v1061_v4  ;;  %v737_v5 = vpack.c.bf16 %v259_v2, %v258_v1  ;;  %v261_v6 = vld [vmem:[#allocation7 + $0x18] sm:$0xff]  ;;  %698 = vmatprep.mubr.msk.f32.mxu0 %vm1062_vm0, %v1063_v7  ;;  %v262_v9 = vld [vmem:[#allocation7 + $0x20] sm:$0xff]  ;;  %v263_v10 = vld [vmem:[#allocation7 + $0x28] sm:$0xff]  ;;  %v1064_v41 = vmov 4   ;;  %p468_p9 = scmp.eq.s32.totalorder %s1043_s15, 1 }
  0x75   : > { %760 = vmatprep.subr.bf16.mxu1 %v1061_v4  ;;  %733 = vmatprep.mubr.msk.f32.mxu1 %vm1062_vm0, %v1063_v7  ;;  %v740_v8 = vpack.c.bf16 %v261_v6, %v260_v3  ;;  %v594_v11 = vld [vmem:[#allocation9] sm:$0xff]   ;;  %v743_v12 = vpack.c.bf16 %v263_v10, %v262_v9  ;;  %v625_v13 = vld [vmem:[#allocation9 + $0x8] sm:$0xff]   ;;  %v264_v14 = vld [vmem:[#allocation7 + $0x30] sm:$0xff] }
  0x76   : > { %738 = vmatpush3.bf16.msra.mxu0 %v737_v5  ;;  %762 = vmatpush3.bf16.msra.mxu1 %v594_v11  ;;  %v265_v15 = vld [vmem:[#allocation7 + $0x38] sm:$0xff]  ;;  %v626_v17 = vld [vmem:[#allocation9 + $0x10] sm:$0xff]   ;;  %v266_v18 = vld [vmem:[#allocation7 + $0x40] sm:$0xff] }
  0x77   : > { %739 = vmatprep.subr.bf16.mxu0 %v1061_v4  ;;  %763 = vmatprep.subr.bf16.mxu1 %v1061_v4  ;;  %v746_v16 = vpack.c.bf16 %v265_v15, %v264_v14  ;;  %v267_v19 = vld [vmem:[#allocation7 + $0x48] sm:$0xff]  ;;  %v627_v21 = vld [vmem:[#allocation9 + $0x18] sm:$0xff]   ;;  %v268_v22 = vld [vmem:[#allocation7 + $0x50] sm:$0xff] }
  0x78   : > { %v749_v20 = vpack.c.bf16 %v267_v19, %v266_v18  ;;  %v269_v23 = vld [vmem:[#allocation7 + $0x58] sm:$0xff]  ;;  %v270_v25 = vld [vmem:[#allocation7 + $0x60] sm:$0xff]  ;;  %v271_v26 = vld [vmem:[#allocation7 + $0x68] sm:$0xff]  ;;  %876 = vset.pattern.permute.xlu0 %v1064_v41 }
  0x79   : > { %v752_v24 = vpack.c.bf16 %v269_v23, %v268_v22  ;;  %v755_v27 = vpack.c.bf16 %v271_v26, %v270_v25  ;;  %v272_v28 = vld [vmem:[#allocation7 + $0x70] sm:$0xff]  ;;  %v273_v29 = vld [vmem:[#allocation7 + $0x78] sm:$0xff]  ;;  %v628_v32 = vld [vmem:[#allocation9 + $0x20] sm:$0xff]  }
  0x7a   : > { %741 = vmatpush3.bf16.msra.mxu0 %v740_v8  ;;  %765 = vmatpush3.bf16.msra.mxu1 %v625_v13  ;;  %v758_v30 = vpack.c.bf16 %v273_v29, %v272_v28  ;;  %v257_v31 = vld [vmem:[%s219_s5] sm:$0xff]  ;;  %v629_v33 = vld [vmem:[#allocation9 + $0x28] sm:$0xff]  }
  0x7b   : > { %742 = vmatprep.subr.bf16.mxu0 %v1061_v4  ;;  %766 = vmatprep.subr.bf16.mxu1 %v1061_v4  ;;  %v630_v34 = vld [vmem:[#allocation9 + $0x30] sm:$0xff]   ;;  %v631_v35 = vld [vmem:[#allocation9 + $0x38] sm:$0xff]   ;;  %v464_v48 = vld [vmem:[#allocation3] sm:$0xff] }
  0x7e   : > { %744 = vmatpush3.bf16.msra.mxu0 %v743_v12  ;;  %768 = vmatpush3.bf16.msra.mxu1 %v626_v17 }
  0x7f   : > { %745 = vmatprep.subr.bf16.mxu0 %v1061_v4  ;;  %769 = vmatprep.subr.bf16.mxu1 %v1061_v4 }
  0x82   : > { %747 = vmatpush3.bf16.msra.mxu0 %v746_v16  ;;  %771 = vmatpush3.bf16.msra.mxu1 %v627_v21 }
  0x83   : > { %748 = vmatprep.subr.bf16.mxu0 %v1061_v4  ;;  %772 = vmatprep.subr.bf16.mxu1 %v1061_v4 }
  0x86   : > { %750 = vmatpush3.bf16.msra.mxu0 %v749_v20  ;;  %774 = vmatpush3.bf16.msra.mxu1 %v628_v32 }
  0x87   : > { %751 = vmatprep.subr.bf16.mxu0 %v1061_v4  ;;  %775 = vmatprep.subr.bf16.mxu1 %v1061_v4 }
  0x8a   : > { %753 = vmatpush3.bf16.msra.mxu0 %v752_v24  ;;  %777 = vmatpush3.bf16.msra.mxu1 %v629_v33 }
  0x8b   : > { %754 = vmatprep.subr.bf16.mxu0 %v1061_v4  ;;  %778 = vmatprep.subr.bf16.mxu1 %v1061_v4 }
  0x8e   : > { %756 = vmatpush3.bf16.msra.mxu0 %v755_v27  ;;  %780 = vmatpush3.bf16.msra.mxu1 %v630_v34 }
  0x8f   : > { %757 = vmatprep.subr.bf16.mxu0 %v1061_v4  ;;  %781 = vmatprep.subr.bf16.mxu1 %v1061_v4 }
  0x92   : > { %759 = vmatpush3.bf16.msra.mxu0 %v758_v30  ;;  %783 = vmatpush3.bf16.msra.mxu1 %v631_v35 }
  0x95   : > { %699 = vmatmul.mubr.f32.vlgmr.msra.gmra.mrb[0].mxu0 %v257_v31 }
 0x168   : > { %v340_v36 = vpop.f32.mrb[0].mxu0 }
 0x169   : > { %v344_v37 = vmin.f32 %v340_v36, 46.0517  ;;  %v700_v38 = vpop.f32.mrb[1].mxu0 }
 0x16b   : > { %v345_v39 = vmul.f32 1.442695, %v344_v37 }
 0x16d   : > { %877 = vpow2.f32 %v345_v39 }
 0x177   : > { %v878_v40 = vpop.eup %877 }
 0x178   : > { %734 = vmatmul.mubr.f32.vlgmr.msra.gmra.mrb[0].mxu1 %v878_v40 }
 0x24b   : > { %v446_v42 = vpop.f32.mrb[0].mxu1 }
 0x24c   : > { %v456_v43 = vmax.f32 %v446_v42, 1e-20  ;;  %v735_v44 = vpop.f32.mrb[1].mxu1 }
 0x24e   : > { %879 = vrcp.f32 %v456_v43 }
 0x258   : > { %v880_v45 = vpop.eup %879 }
 0x259   : > { %460 = vperm.xlu0 %876, %v880_v45  }
 0x2d8   : > { %v461_v46 = vpop.permute.xlu0 %460 }
 0x2d9   : > { %v463_v47 = vmul.f32 %v461_v46, %v456_v43  ;;  %472 = sbr.rel (!%p468_p9) target bundleno = 748 (0x2ec), region = 60 }
 0x2db   : > { %v465_v49 = vmul.f32 0.5, %v463_v47 }
 0x2dd   : > { %v466_v50 = vadd.f32 %v465_v49, %v464_v48 }
 0x2df   : > { %467 = vst [vmem:[#allocation3] sm:$0xff] %v466_v50 }
 0x2e6   : > { %v473_v51 = vld [vmem:[#allocation3] sm:$0xff] }
 0x2e7   : > { %v474_v52 = vmax.f32 %v473_v51, 0.0 }
 0x2e9   : > { %v475_v53 = vmin.f32 %v474_v52, 1.0 }
 0x2eb   : > { %476 = vst [vmem:[#allocation10] sm:$0xff] %v475_v53 }
 0x2ec PF: > { %p1280_p8 = scmp.eq.s32.totalorder %s574_s18, 1  ;;  %s1065_s15 = smov [#allocation10]  }
 0x2ed   : > { %s486_s20 = sshll.u32 %s1065_s15, 4  ;;  %s487_s20 = int_to_ptr.vmem [resolvable:$true] %s486_s20 }
 0x2ee   : > { %s967_s21 = scalar_lea.vmem %s487_s20, 128  ;;  %p974_p10 = scmp.lt.s32.totalorder %s487_s20, %s487_s20 }
 0x2ef   : > { %p968_p1 = scmp.ne.s32.totalorder %s487_s20, %s967_s21  ;;  %p975_p11 = scmp.lt.s32.totalorder %s967_s21, %s967_s21 }
 0x2f1   : > { %p969_p4 = pnand %p968_p1, %p1280_p8  ;;  %p976_p13 = por %p975_p11, %p974_p10 }
 0x2f3   : > { %p970_p5 = pneg %p969_p4 }
 0x2f5   : > { %p977_p2 = pnand %p976_p13, %p970_p5 }
 0x2f7   : > { %980 = shalt.err (!%p977_p2)
}
 0x2f8   : > { %s981_s18 = scalar_lea.hbm %s1327_s3, 128 }
 0x2f9   : > { %p982_p3 = scmp.ne.s32.totalorder %s1327_s3, %s981_s18  ;;  %p987_p6 = scmp.lt.u32.totalorder %s981_s18, %s1327_s3 }
 0x2fb   : > { %p983_p0 = pnand %p982_p3, %p1280_p8 }
 0x2fd   : > { %p984_p12 = pneg %p983_p0 }
 0x2ff   : > { %p989_p7 = pnand %p987_p6, %p984_p12 }
 0x301   : > { %992 = shalt.err (!%p989_p7)
}
 0x302   : > { %795 = dma.vmem_to_hbm [thread:$0]  (%p1280_p8), %s487_s20, 128, %s1327_s3, [#allocation6]  }
 0x303   : > { %1026 = dma.done.wait (%p1280_p8), [#allocation6], 128  }
 0x304   : > { %1028 = vsyncadd (%p1280_p8), [#allocation6], 4294967168 }
 0x305 PF: > { %s18_s17 = sadd.s32 1, %s1051_s17   ;;  %s1341_s12 = smov %s1035_s13 }
 0x306   : > { %p15_p9 = scmp.ge.s32.totalorder %s18_s17, 4   ;;  %s1342_s13 = smov %s1039_s14 }
 0x307   : > { %s1343_s14 = smov %s1204_s22  ;;  %s1344_s15 = smov %s1047_s16 }
 0x308   : > { %s1345_s16 = smov %s1347_s8  ;;  %17 = sbr.rel (!%p15_p9) target bundleno = 6 (0x6), region = 96 }
 0x30f   :  { %499 = vsyncpa [#allocation5], 1 }
 0x310   :  { %501 = vsyncpa [#allocation5 + $0x1], 1 }
 0x311   :  { %502 = vsyncpa [#allocation8], 1 }
 0x312   :  { %503 = vsyncpa [#allocation6], 1 }
 0x313   :  { %505 = vsyncpa [#allocation6 + $0x1], 1 }

</bundles_post_ra>
